<compile_context>
chip_gen: v7x
topology: tpu7x:2x2x1
jax: 0.10.0
libtpu: 0.0.40
codegen_flags: <defaults>
</compile_context>

<pallas_src>
import functools

import jax
import jax.numpy as jnp
from jax import lax
from jax.experimental import pallas as pl
from jax.experimental.pallas import tpu as pltpu


def _round_up(x, m):
    return ((x + m - 1) // m) * m


def _tpu_kind():
    try:
        return jax.devices()[0].device_kind.lower()
    except Exception:
        return ""


def _vmem_plan():
    """(per-block f32-basis byte cap, scoped vmem limit) in bytes."""
    kind = _tpu_kind()
    if "v7" in kind:
        # v7x: 64 MiB physical VMEM per TensorCore -> smaller blocks, modest limit.
        return 2 << 20, 48 << 20
    # v5e / v6e: 128 MiB physical VMEM; raise scoped limit past v5e's 16 MiB default.
    return 4 << 20, 64 << 20


def _rmsnorm_kernel(x_ref, w_ref, o_ref, *, eps, inv_dim):
    # x_ref: (row_tile, dim), w_ref: (1, dim).  All math in f32, one cast at store.
    xf = x_ref[...].astype(jnp.float32)
    # Sum of squares in f32; fold 1/dim into the rsqrt argument:
    #   inv = 1 / sqrt(mean(x^2) + eps)   (EUP rsqrt, no sqrt+divide)
    sumsq = jnp.sum(xf * xf, axis=-1, keepdims=True)
    inv = lax.rsqrt(sumsq * inv_dim + eps)
    y = (xf * inv) * w_ref[...].astype(jnp.float32)
    o_ref[...] = y.astype(o_ref.dtype)


def rmsnorm(x, weight, eps=1e-8, *, row_tile=None):
    """RMSNorm over the last axis of x, scaled by weight (shape (dim,))."""
    orig_shape = x.shape
    dim = orig_shape[-1]
    assert weight.shape == (dim,)

    rows = 1
    for s in orig_shape[:-1]:
        rows *= s

    x2d = x.reshape(rows, dim)
    w2d = weight.reshape(1, dim)

    itemsize = jnp.dtype(x.dtype).itemsize
    sub = 8 * max(1, 4 // itemsize)  # sublane multiple: 8 f32 / 16 bf16 / 32 i8

    f32_block_cap, vmem_limit = _vmem_plan()

    if row_tile is None:
        # Cap the block at the HBM-bandwidth plateau, sized on an f32 basis so
        # the in-kernel f32 upcast/temporaries stay bounded even for bf16 inputs.
        row_budget = max(sub, f32_block_cap // (dim * 4))
        row_budget = max(sub, (row_budget // sub) * sub)
        row_tile = min(row_budget, _round_up(rows, sub))
        # Aim for >= 8 grid steps when rows allow: better megacore balance on
        # v7x (2 TensorCores) and full DMA/compute overlap everywhere.
        min_steps = 8
        if pl.cdiv(rows, row_tile) < min_steps and row_tile > sub:
            row_tile = max(sub, _round_up(pl.cdiv(rows, min_steps), sub))
    row_tile = max(sub, (row_tile // sub) * sub)

    grid = (pl.cdiv(rows, row_tile),)

    kernel = functools.partial(
        _rmsnorm_kernel, eps=float(eps), inv_dim=1.0 / float(dim)
    )

    # NOTE: no row/dim padding.  The partial last row-block (if any) reads
    # garbage in the OOB rows and its OOB writes are dropped; dim is used at its
    # true size (block last dim == full array dim), so the post-call reshape is
    # a pure metadata op.
    # TODO(synk): if step counts get very large for tiny dims, consider
    # pipeline_mode=pl.Buffered(3) on the x BlockSpec.
    out2d = pl.pallas_call(
        kernel,
        out_shape=jax.ShapeDtypeStruct((rows, dim), x.dtype),
        grid_spec=pltpu.PrefetchScalarGridSpec(
            num_scalar_prefetch=0,
            grid=grid,
            in_specs=[
                pl.BlockSpec((row_tile, dim), lambda i: (i, 0)),
                pl.BlockSpec((1, dim), lambda i: (0, 0)),
            ],
            out_specs=pl.BlockSpec((row_tile, dim), lambda i: (i, 0)),
        ),
        compiler_params=pltpu.CompilerParams(
            dimension_semantics=("parallel",),
            vmem_limit_bytes=vmem_limit,
        ),
    )(x2d, w2d)

    return out2d.reshape(orig_shape)


def _ref_rmsnorm(x, weight, eps):
    xf = x.astype(jnp.float32)
    norm = jnp.sqrt(jnp.mean(xf ** 2, axis=-1, keepdims=True) + eps)
    return (weight.astype(jnp.float32) * (xf / norm)).astype(x.dtype)


if __name__ == "__main__":
    key = jax.random.PRNGKey(0)
    eps = 1e-8

    # Case 1: module-default init (weight = ones), shapes from the spec.
    batch, seq, hidden = 2, 8, 32
    k1, k2 = jax.random.split(key)
    x = jax.random.normal(k1, (batch, seq, hidden), dtype=jnp.float32)
    weight = jnp.ones((hidden,), dtype=jnp.float32)
    out = jax.block_until_ready(rmsnorm(x, weight, eps))
    ref = _ref_rmsnorm(x, weight, eps)
    assert out.shape == x.shape
    assert jnp.allclose(out, ref, atol=1e-5, rtol=1e-5)

    # Case 2: rows not divisible by the row tile (exercises the partial last
    # block / garbage-in-garbage-out path) with a non-trivial weight.
    x2 = jax.random.normal(k2, (3, 5, hidden), dtype=jnp.float32)
    w2 = 0.5 + jax.random.uniform(k2, (hidden,), dtype=jnp.float32)
    out2 = jax.block_until_ready(rmsnorm(x2, w2, eps))
    ref2 = _ref_rmsnorm(x2, w2, eps)
    assert out2.shape == x2.shape
    assert jnp.allclose(out2, ref2, atol=1e-5, rtol=1e-5)

    print("KERNEL_OK")
</pallas_src>

<mosaic_0001>
module attributes {stable_mosaic.version = 11 : i64} {
  func.func @_rmsnorm_kernel(%arg0: i32, %arg1: memref<8x32xf32, #tpu.memory_space<vmem>>, %arg2: memref<1x32xf32, #tpu.memory_space<vmem>>, %arg3: memref<8x32xf32, #tpu.memory_space<vmem>>) attributes {dimension_semantics = [#tpu.dimension_semantics<parallel>], iteration_bounds = array<i64: 2>, scalar_prefetch = 0 : i64, scratch_operands = 0 : i64, tpu.core_type = #tpu.core_type<tc>, window_params = [{transform_indices = @transform_0, window_bounds = array<i64: 8, 32>}, {pipeline_mode = #tpu.pipeline_mode<synchronous>, transform_indices = @transform_1, window_bounds = array<i64: 1, 32>}, {transform_indices = @transform_2, window_bounds = array<i64: 8, 32>}]} {
    %c0 = arith.constant 0 : index
    %c0_0 = arith.constant 0 : index
    %0 = vector.load %arg1[%c0, %c0_0] : memref<8x32xf32, #tpu.memory_space<vmem>>, vector<8x32xf32>
    %1 = arith.mulf %0, %0 : vector<8x32xf32>
    %cst = arith.constant dense<0.000000e+00> : vector<8xf32>
    %2 = vector.multi_reduction <add>, %1, %cst [1] : vector<8x32xf32> to vector<8xf32>
    %3 = vector.shape_cast %2 : vector<8xf32> to vector<8x1xf32>
    %cst_1 = arith.constant 3.125000e-02 : f32
    %4 = vector.broadcast %cst_1 : f32 to vector<8x1xf32>
    %5 = arith.mulf %3, %4 : vector<8x1xf32>
    %cst_2 = arith.constant 9.99999993E-9 : f32
    %6 = vector.broadcast %cst_2 : f32 to vector<8x1xf32>
    %7 = arith.addf %5, %6 : vector<8x1xf32>
    %8 = math.rsqrt %7 : vector<8x1xf32>
    %9 = vector.broadcast %8 : vector<8x1xf32> to vector<8x32xf32>
    %10 = arith.mulf %0, %9 : vector<8x32xf32>
    %c0_3 = arith.constant 0 : index
    %c0_4 = arith.constant 0 : index
    %11 = vector.load %arg2[%c0_3, %c0_4] : memref<1x32xf32, #tpu.memory_space<vmem>>, vector<1x32xf32>
    %12 = vector.broadcast %11 : vector<1x32xf32> to vector<8x32xf32>
    %13 = arith.mulf %10, %12 : vector<8x32xf32>
    %c0_5 = arith.constant 0 : index
    %c0_6 = arith.constant 0 : index
    %14 = vector.load %arg3[%c0_5, %c0_6] : memref<8x32xf32, #tpu.memory_space<vmem>>, vector<8x32xf32>
    tpu.vector_store %arg3[%c0_5, %c0_6], %13 {strides = array<i32>} : memref<8x32xf32, #tpu.memory_space<vmem>>, vector<8x32xf32>,
    return
  }
  func.func @transform_0(%arg0: i32) -> (i32, i32) {
    %c0_i32 = arith.constant 0 : i32
    %c0_i32_0 = arith.constant 0 : i32
    return %arg0, %c0_i32 : i32, i32
  }
  func.func @transform_1(%arg0: i32) -> (i32, i32) {
    %c0_i32 = arith.constant 0 : i32
    %c0_i32_0 = arith.constant 0 : i32
    %c0_i32_1 = arith.constant 0 : i32
    return %c0_i32, %c0_i32_0 : i32, i32
  }
  func.func @transform_2(%arg0: i32) -> (i32, i32) {
    %c0_i32 = arith.constant 0 : i32
    %c0_i32_0 = arith.constant 0 : i32
    return %arg0, %c0_i32 : i32, i32
  }
}

</mosaic_0001>

<bundles_post_ra>
// kernel: tpu_custom_call.1
= control target key start
LH: loop header
LB: loop body
LE: loop exit
PB: predicated region body
PF: predicated region fallthrough
CT: control target
= control target key end

     0   :  { %7 = vsyncpa [#allocation3], 0  ;;  %s710_s0 = inlined_call_operand.hbm [shape: f32[16,32], index: 0, kind: input, shape index: {}]   ;;  %s711_s1 = inlined_call_operand.hbm [shape: f32[1,32], index: 1, kind: input, shape index: {}]   ;;  %s712_s2 = inlined_call_operand.hbm [shape: f32[16,32], index: 2, kind: output, shape index: {}]  }
   0x1   :  { %9 = vsyncpa [#allocation3 + $0x1], 0 }
   0x2   :  { %10 = vsyncpa [#allocation6], 0 }
   0x3   :  { %11 = vsyncpa [#allocation4], 0 }
   0x4   :  { %13 = vsyncpa [#allocation4 + $0x1], 0  ;;  %s507_s9 = smov 0   ;;  %s509_s10 = smov 0  }
   0x5   :  { %s511_s11 = smov 0   ;;  %s513_s12 = smov 0  }
   0x6 LB: > { %s528_s13 = sadd.s32 4294967295, %s487_s12   ;;  %s285_s14 = sadd.s32 4294967294, %s487_s12   ;;  %s487_s12 = sphi %s513_s12, %s736_s12   ;;  %s483_s11 = sphi %s511_s11, %s735_s11   ;;  %s479_s10 = sphi %s509_s10, %s734_s10   ;;  %s475_s9 = sphi %s507_s9, %s733_s9  }
   0x7   : > { %p39_p0 = scmp.ne.s32.totalorder %s479_s10, %s475_s9  ;;  %p713_p1 = scmp.eq.s32.totalorder %s528_s13, 0 }
   0x8   : > { %p90_p3 = scmp.eq.s32.totalorder %s285_s14, 1  ;;  %p286_p5 = scmp.ge.s32.totalorder %s487_s12, 1 }
   0x9   : > { %p537_p4 = por %p713_p1, %p39_p0  ;;  %p97_p7 = scmp.lt.s32.totalorder %s487_s12, 3 }
   0xa   : > { %p542_p6 = por %p90_p3, %p39_p0  ;;  %s489_s18 = smov [#allocation5]  }
   0xb   : > { %s716_s15 = scalar_select %p537_p4, 1, 0 }
   0xc   : > { %s717_s16 = scalar_select %p542_p6, 1, 0 }
   0xd   : > { %p547_p8 = pnand %p286_p5, %p97_p7  ;;  %s110_s19 = sshll.u32 %s489_s18, 4  ;;  %s111_s19 = int_to_ptr.vmem [resolvable:$true] %s110_s19 }
   0xe   : > { %s555_s20 = sadd.s32 1, %s487_s12   ;;  %s26_s24 = sadd.s32 1, %s483_s11 }
   0xf   : > { %s718_s17 = scalar_select %p547_p8, 1, 0 }
  0x10   : > { %p308_p10 = pneg %p547_p8  ;;  %s23_s22 = ssub.s32 %s487_s12, %s555_s20 }
  0x11   : > { %p565_p12 = scmp.eq.s32.totalorder %s23_s22, 0  ;;  %s359_s27 = scalar_lea.hbm %s711_s1, 16 }
  0x12   : > { %p559_p11 = pnand %p308_p10, %p713_p1  ;;  %p360_p0 = scmp.ne.s32.totalorder %s711_s1, %s359_s27 }
  0x13   : > { %s720_s23 = scalar_select %p565_p12, 1, 0 }
  0x14   : > { %p361_p3 = pneg %p559_p11  ;;  %p366_p10 = scmp.lt.u32.totalorder %s359_s27, %s711_s1 }
  0x16   : > { %p362_p5 = pnand %p361_p3, %p360_p0 }
  0x18   : > { %p363_p7 = pneg %p362_p5 }
  0x1a   : > { %p368_p9 = pnand %p366_p10, %p363_p7 }
  0x1c   : > { %371 = shalt.err (!%p368_p9)
}
  0x1d   : > { %s372_s4 = scalar_lea.vmem %s111_s19, 16  ;;  %s379_s5 = scalar_lea.vmem %s111_s19, 32 }
  0x1e   : > { %p373_p1 = scmp.ne.s32.totalorder %s111_s19, %s372_s4  ;;  %p380_p6 = scmp.lt.s32.totalorder %s111_s19, %s111_s19 }
  0x1f   : > { %p381_p4 = scmp.lt.s32.totalorder %s379_s5, %s372_s4 }
  0x20   : > { %p375_p2 = pnand %p373_p1, %p361_p3 }
  0x21   : > { %p382_p8 = por %p381_p4, %p380_p6 }
  0x22   : > { %p376_p13 = pneg %p375_p2 }
  0x24   : > { %p383_p12 = pnand %p382_p8, %p376_p13 }
  0x26   : > { %386 = shalt.err (!%p383_p12)
}
  0x27   : > { %311 = dma.hbm_to_vmem [thread:$0]  (!%p559_p11), %s711_s1, 16, %s111_s19, [#allocation6]  }
  0x28   : > { %p721_p1 = scmp.ne.s32.totalorder %s720_s23, 0  ;;  %p34_p2 = scmp.eq.s32.totalorder %s487_s12, 0 }
  0x29   : > { %p722_p4 = scmp.ne.s32.totalorder %s483_s11, %s479_s10  ;;  %p723_p6 = scmp.eq.s32.totalorder %s528_s13, 1 }
  0x2a   : > { %s591_s8 = scalar_select %p721_p1, %s483_s11, %s26_s24  }
  0x2b   : > { %p599_p8 = por %p723_p6, %p722_p4  ;;  %p321_p9 = scmp.lt.s32.totalorder %s487_s12, 2 }
  0x2c   : > { %s121_s18 = sand.u32 1, %s483_s11   ;;  %p725_p12 = pmov %p722_p4 }
  0x2d   : > { %s289_s21 = sshll.u32 %s121_s18, 3  ;;  %s290_s22 = sshll.u32 %s487_s12, 7 }
  0x2e   : > { %p35_p13 = por %p34_p2, %p725_p12  ;;  %s612_s19 = scalar_lea.hbm %s710_s0, %s290_s22 }
  0x2f   : > { %s125_s23 = scalar_lea.vmem [#allocation2], %s289_s21  ;;  %s122_s28 = scalar_lea.sflag [#allocation3], %s121_s18 }
  0x30   : > { %s132_s24 = sshll.u32 %s125_s23, 4  ;;  %p614_p11 = pnand %p321_p9, %p35_p13  ;;  %s618_s24 = int_to_ptr.vmem [resolvable:$true] %s132_s24 }
  0x31   : > { %s387_s29 = scalar_lea.hbm %s612_s19, 128  ;;  %s392_s4 = scalar_lea.hbm %s710_s0, 256 }
  0x32   : > { %p388_p0 = scmp.ne.s32.totalorder %s612_s19, %s387_s29  ;;  %p389_p3 = pneg %p614_p11 }
  0x33   : > { %p393_p10 = scmp.lt.u32.totalorder %s612_s19, %s710_s0  ;;  %p394_p1 = scmp.lt.u32.totalorder %s392_s4, %s387_s29 }
  0x34   : > { %p390_p5 = pnand %p389_p3, %p388_p0  ;;  %p396_p4 = scmp.lt.u32.totalorder %s387_s29, %s612_s19 }
  0x35   : > { %p395_p2 = por %p394_p1, %p393_p10 }
  0x36   : > { %p391_p7 = pneg %p390_p5 }
  0x37   : > { %p397_p6 = por %p396_p4, %p395_p2 }
  0x39   : > { %p398_p9 = pnand %p397_p6, %p391_p7 }
  0x3b   : > { %401 = shalt.err (!%p398_p9)
}
  0x3c   : > { %s402_s7 = scalar_lea.vmem %s618_s24, 128  ;;  %s490_s18 = smov [#allocation2]  }
  0x3d   : > { %p403_p12 = scmp.ne.s32.totalorder %s618_s24, %s402_s7  ;;  %s407_s21 = sshll.u32 %s490_s18, 4  ;;  %s408_s21 = int_to_ptr.vmem [resolvable:$false] %s407_s21 }
  0x3e   : > { %s409_s22 = scalar_lea.vmem %s408_s21, 256  ;;  %p410_p5 = scmp.lt.s32.totalorder %s618_s24, %s408_s21 }
  0x3f   : > { %p405_p13 = pnand %p403_p12, %p389_p3  ;;  %p411_p10 = scmp.lt.s32.totalorder %s409_s22, %s402_s7 }
  0x41   : > { %p406_p0 = pneg %p405_p13  ;;  %p412_p1 = por %p411_p10, %p410_p5 }
  0x43   : > { %p413_p2 = pnand %p412_p1, %p406_p0 }
  0x45   : > { %416 = shalt.err (!%p413_p2)
}
  0x46   : > { %315 = dma.hbm_to_vmem [thread:$0]  (!%p614_p11), %s612_s19, 128, %s618_s24, %s122_s28  }
  0x47   : > { %p727_p7 = scmp.ne.s32.totalorder %s718_s17, 0 }
  0x48   : > { %s648_s25 = sand.u32 (!%p727_p7), 1, %s479_s10   ;;  %p728_p3 = scmp.ne.s32.totalorder (!%p727_p7), %s716_s15, 0 }
  0x49   : > { %141 = sbr.rel (%p727_p7) target bundleno = 263 (0x107), region = 28  ;;  %s292_s26 = sshll.u32 (!%p727_p7), %s648_s25, 3 }
  0x4a   : > { %s144_s23 = scalar_lea.sflag (!%p727_p7), [#allocation3], %s648_s25  ;;  %s147_s29 = scalar_lea.vmem (!%p727_p7), [#allocation2], %s292_s26 }
  0x50   : > { %462 = dma.done.wait (%p728_p3), %s144_s23, 128  }
  0x51   : > { %464 = vsyncadd (%p728_p3), %s144_s23, 4294967168  ;;  %p729_p4 = scmp.eq.s32.totalorder %s528_s13, 0 }
  0x53   : > { %466 = dma.done.wait (%p729_p4), [#allocation6], 16   ;;  %p730_p11 = pmov %p729_p4 }
  0x54   : > { %v172_v0 = vld [vmem:[%s147_s29] sm:$0xff]  ;;  %vm174_vm0 = vcmask 261120   ;;  %v295_v7 = vld [vmem:[#allocation5] ss:$0 sm:$0xff]  ;;  %s297_s15 = sshll.u32 %s528_s13, 7  ;;  %s171_s17 = scalar_lea.vmem [#allocation7], %s292_s26 }
  0x55   : > { %468 = vsyncadd (%p730_p11), [#allocation6], 4294967280  ;;  %v173_v1 = vmul.f32 %v172_v0, %v172_v0  ;;  %s205_s19 = sshll.u32 %s171_s17, 4  ;;  %s665_s28 = scalar_lea.hbm %s712_s2, %s297_s15  ;;  %s667_s19 = int_to_ptr.vmem [resolvable:$true] %s205_s19 }
  0x56   : > { %s192_s30 = scalar_lea.sflag [#allocation4], %s648_s25  ;;  %s417_s3 = scalar_lea.vmem %s667_s19, 128 }
  0x57   : > { %v175_v2 = vsel %vm174_vm0, %v173_v1, 0.0  ;;  %p418_p6 = scmp.ne.s32.totalorder %s667_s19, %s417_s3  ;;  %s491_s13 = smov [#allocation7]  }
  0x58   : > { %176 = vadd.xlane.f32.xlu0 %v175_v2  ;;  %s421_s4 = sshll.u32 %s491_s13, 4  ;;  %s422_s4 = int_to_ptr.vmem [resolvable:$false] %s421_s4 }
  0x59   : > { %p419_p9 = pnand %p418_p6, %p599_p8  ;;  %s423_s5 = scalar_lea.vmem %s422_s4, 256 }
  0x5a   : > { %p424_p13 = scmp.lt.s32.totalorder %s667_s19, %s422_s4  ;;  %p425_p0 = scmp.lt.s32.totalorder %s423_s5, %s417_s3 }
  0x5b   : > { %p420_p12 = pneg %p419_p9 }
  0x5c   : > { %p426_p5 = por %p425_p0, %p424_p13 }
  0x5e   : > { %p427_p10 = pnand %p426_p5, %p420_p12 }
  0xe5   : > { %v177_v3 = vpop.xlane.xlu0 %176 }
  0xe6   : > { %v178_v4 = vmul.f32 0.03125, %v177_v3 }
  0xe8   : > { %v179_v5 = vadd.f32 1e-08, %v178_v4 }
  0xea   : > { %357 = vrsqrt.f32 %v179_v5 }
  0xf4   : > { %v358_v6 = vpop.eup %357 }
  0xf5   : > { %v181_v8 = vmul.f32 %v358_v6, %v172_v0 }
  0xf7   : > { %v189_v9 = vmul.f32 %v295_v7, %v181_v8 }
  0xf9   : > { %190 = vst.msk [vmem:[%s171_s17] sm:$0xff] %vm174_vm0, %v189_v9 }
  0xfa   : > { %430 = shalt.err (!%p427_p10)
}
  0xfb   : > { %s431_s6 = scalar_lea.hbm %s665_s28, 128  ;;  %s435_s21 = scalar_lea.hbm %s712_s2, 256 }
  0xfc   : > { %p432_p1 = scmp.ne.s32.totalorder %s665_s28, %s431_s6  ;;  %p436_p3 = scmp.lt.u32.totalorder %s665_s28, %s712_s2 }
  0xfd   : > { %p437_p4 = scmp.lt.u32.totalorder %s435_s21, %s431_s6  ;;  %p439_p6 = scmp.lt.u32.totalorder %s431_s6, %s665_s28 }
  0xfe   : > { %p433_p2 = pnand %p432_p1, %p599_p8 }
  0xff   : > { %p438_p11 = por %p437_p4, %p436_p3 }
 0x100   : > { %p434_p7 = pneg %p433_p2 }
 0x101   : > { %p440_p9 = por %p439_p6, %p438_p11 }
 0x103   : > { %p441_p12 = pnand %p440_p9, %p434_p7 }
 0x105   : > { %444 = shalt.err (!%p441_p12)
}
 0x106   : > { %306 = dma.vmem_to_hbm [thread:$0]  (%p599_p8), %s667_s19, 128, %s665_s28, %s192_s30  }
 0x107 PF: > { %s217_s26 = sand.u32 1, %s475_s9   ;;  %p731_p13 = scmp.ne.s32.totalorder %s717_s16, 0 }
 0x108   : > { %p732_p0 = scmp.ge.s32.totalorder %s487_s12, 2  ;;  %s218_s23 = scalar_lea.sflag [#allocation4], %s217_s26 }
 0x10a   : > { %p317_p5 = pnand %p732_p0, %p731_p13 }
 0x10c   : > { %470 = dma.done.wait (!%p317_p5), %s218_s23, 128  }
 0x10d   : > { %472 = vsyncadd (!%p317_p5), %s218_s23, 4294967168  ;;  %p16_p10 = scmp.ge.s32.totalorder %s555_s20, 4   ;;  %s733_s9 = smov %s479_s10 }
 0x10e   : > { %s734_s10 = smov %s483_s11  ;;  %s735_s11 = smov %s591_s8 }
 0x10f   : > { %s736_s12 = smov %s555_s20  ;;  %18 = sbr.rel (!%p16_p10) target bundleno = 6 (0x6), region = 77 }
 0x116   :  { %223 = vsyncpa [#allocation3], 1 }
 0x117   :  { %225 = vsyncpa [#allocation3 + $0x1], 1 }
 0x118   :  { %226 = vsyncpa [#allocation6], 1 }
 0x119   :  { %227 = vsyncpa [#allocation4], 1 }
 0x11a   :  { %229 = vsyncpa [#allocation4 + $0x1], 1 }

</bundles_post_ra>
